<compile_context>
chip_gen: v5e
topology: v5e:2x2
jax: 0.10.0
libtpu: 0.0.40
codegen_flags: <defaults>
</compile_context>

<pallas_src>
import functools

import jax
import jax.numpy as jnp
from jax import lax
from jax.experimental import pallas as pl
from jax.experimental.pallas import tpu as pltpu

LANES = 128
SUBLANES = 8
CHUNK_ROWS = 512            # inner-loop chunk: (512, 128) f32 = 256 KiB/operand


def _masked_mse_kernel(pred_ref, tgt_ref, sum_ref, cnt_ref, *,
                       tile_rows, chunk_rows, num_blocks, valid_rows_last):
    """One grid step: (8,128) (sum, count) partials of a (tile_rows, 128) tile."""
    i = pl.program_id(0)
    num_chunks = tile_rows // chunk_rows
    k = chunk_rows // SUBLANES

    def chunk_partials(base_row, mask_tail_rows):
        t = tgt_ref[pl.ds(base_row, chunk_rows), :].astype(jnp.float32)
        p = pred_ref[pl.ds(base_row, chunk_rows), :].astype(jnp.float32)
        valid = t > 0.0
        if mask_tail_rows:
            # Only the (partial) last tile pays for this: rows past the
            # logical end of the array hold unspecified data.
            rid = base_row + lax.broadcasted_iota(
                jnp.int32, (chunk_rows, LANES), 0)
            valid = valid & (rid < valid_rows_last)
        d = jnp.where(valid, t - p, 0.0)
        vf = valid.astype(jnp.float32)
        # Fold the chunk's (8, 128) sublane-tiles together: layout-preserving
        # reshape + elementwise vreg adds (no retile, no XLU).
        s = jnp.sum((d * d).reshape(k, SUBLANES, LANES), axis=0)
        c = jnp.sum(vf.reshape(k, SUBLANES, LANES), axis=0)
        return s, c

    def run(mask_tail_rows):
        def body(j, carry):
            s_acc, c_acc = carry
            base = pl.multiple_of(j * chunk_rows, SUBLANES)
            s, c = chunk_partials(base, mask_tail_rows)
            return s_acc + s, c_acc + c

        init = (jnp.zeros((SUBLANES, LANES), jnp.float32),
                jnp.zeros((SUBLANES, LANES), jnp.float32))
        s_acc, c_acc = lax.fori_loop(0, num_chunks, body, init)
        sum_ref[...] = s_acc
        cnt_ref[...] = c_acc

    if valid_rows_last == tile_rows:
        # Tiles divide the array exactly: single unmasked streaming path.
        run(False)
    else:
        @pl.when(i < num_blocks - 1)
        def _():
            run(False)

        @pl.when(i == num_blocks - 1)
        def _():
            run(True)


def _chip_tile_config():
    """(max_tile_rows, vmem_limit_bytes) tuned per TPU generation."""
    kind = ""
    try:
        kind = jax.devices()[0].device_kind.lower()
    except Exception:
        pass
    if "v5 lite" in kind or "v5lite" in kind or "v5e" in kind:
        # v5e: 2 MiB input blocks (8 MiB double-buffered) — most memory-bound
        # generation, modest scoped-VMEM budget.
        return 4096, 32 * 1024 * 1024
    # v6e / v7x / v4 / v5p / unknown: 4 MiB input blocks (16 MiB double
    # buffered); raise the scoped limit for headroom (still well under v7x's
    # 64 MiB-per-TensorCore physical VMEM).
    return 8192, 48 * 1024 * 1024


def masked_mse_loss(pred, target):
    """Pallas-TPU masked MSE: mean((target - pred)[target > 0] ** 2)."""
    assert pred.ndim == target.ndim, "inconsistent dimensions"
    assert pred.shape == target.shape, "inconsistent shapes"

    n = pred.size
    max_tile_rows, vmem_limit = _chip_tile_config()

    rows = max(SUBLANES, pl.cdiv(n, LANES))
    padded_n = rows * LANES                  # == n on the aligned fast path

    def _as_2d(x):
        flat = x.reshape(-1)                 # free: contiguous reshape
        if padded_n != n:
            # Rare ragged/tiny path (image tensors are lane-aligned).  The
            # zero padding fails `target > 0`, so it never contributes.
            flat = jnp.pad(flat, (0, padded_n - n))
        return flat.reshape(rows, LANES)     # free: no data movement

    p2d = _as_2d(pred)
    t2d = _as_2d(target)

    # Tile / chunk geometry (trace-time Python ints).
    if rows >= CHUNK_ROWS:
        chunk_rows = CHUNK_ROWS
        tile_rows = min(max_tile_rows, (rows // CHUNK_ROWS) * CHUNK_ROWS)
    else:
        tile_rows = (rows // SUBLANES) * SUBLANES
        chunk_rows = tile_rows
    num_blocks = pl.cdiv(rows, tile_rows)
    valid_rows_last = rows - (num_blocks - 1) * tile_rows

    kernel = functools.partial(
        _masked_mse_kernel,
        tile_rows=tile_rows, chunk_rows=chunk_rows,
        num_blocks=num_blocks, valid_rows_last=valid_rows_last)

    out_sum, out_cnt = pl.pallas_call(
        kernel,
        out_shape=(
            jax.ShapeDtypeStruct((num_blocks * SUBLANES, LANES), jnp.float32),
            jax.ShapeDtypeStruct((num_blocks * SUBLANES, LANES), jnp.float32),
        ),
        grid_spec=pltpu.PrefetchScalarGridSpec(
            num_scalar_prefetch=0,
            grid=(num_blocks,),
            in_specs=[
                pl.BlockSpec((tile_rows, LANES), lambda i: (i, 0)),
                pl.BlockSpec((tile_rows, LANES), lambda i: (i, 0)),
            ],
            out_specs=(
                pl.BlockSpec((SUBLANES, LANES), lambda i: (i, 0)),
                pl.BlockSpec((SUBLANES, LANES), lambda i: (i, 0)),
            ),
        ),
        compiler_params=pltpu.CompilerParams(
            dimension_semantics=("parallel",),
            vmem_limit_bytes=vmem_limit),
    )(p2d, t2d)

    # Tiny final reduce + divide over the per-block (8,128) partials.  NaN if
    # no pixel is valid, matching the PyTorch reference semantics.
    return jnp.sum(out_sum) / jnp.sum(out_cnt)


def _ref_masked_mse(pred, target):
    mask = target > 0
    diff = jnp.where(mask, target - pred, 0.0)
    return jnp.sum(diff * diff) / jnp.sum(mask.astype(jnp.float32))


if __name__ == "__main__":
    key = jax.random.PRNGKey(0)
    kp, kt = jax.random.split(key)

    # NCHW inputs, like the depth-prediction use-case of MaskedMSELoss.
    shape = (2, 4, 16, 16)
    pred = jax.random.normal(kp, shape, dtype=jnp.float32)
    target = jax.random.normal(kt, shape, dtype=jnp.float32)   # mix of >0 / <=0

    loss = jax.block_until_ready(masked_mse_loss(pred, target))
    ref = _ref_masked_mse(pred, target)
    assert jnp.allclose(loss, ref, rtol=1e-5, atol=1e-6), (loss, ref)

    # Ragged shape: exercises the padded + partial-last-block (row mask) path.
    shape2 = (3, 5, 7, 11)
    kp2, kt2 = jax.random.split(kt)
    pred2 = jax.random.normal(kp2, shape2, dtype=jnp.float32)
    target2 = jax.random.normal(kt2, shape2, dtype=jnp.float32)
    loss2 = jax.block_until_ready(masked_mse_loss(pred2, target2))
    ref2 = _ref_masked_mse(pred2, target2)
    assert jnp.allclose(loss2, ref2, rtol=1e-5, atol=1e-6), (loss2, ref2)

    print("KERNEL_OK")
</pallas_src>

<mosaic_0001>
module attributes {stable_mosaic.version = 11 : i64} {
  func.func @_masked_mse_kernel(%arg0: i32, %arg1: memref<16x128xf32, #tpu.memory_space<vmem>>, %arg2: memref<16x128xf32, #tpu.memory_space<vmem>>, %arg3: memref<8x128xf32, #tpu.memory_space<vmem>>, %arg4: memref<8x128xf32, #tpu.memory_space<vmem>>) attributes {dimension_semantics = [#tpu.dimension_semantics<parallel>], iteration_bounds = array<i64: 1>, scalar_prefetch = 0 : i64, scratch_operands = 0 : i64, tpu.core_type = #tpu.core_type<tc>, window_params = [{transform_indices = @transform_0, window_bounds = array<i64: 16, 128>}, {transform_indices = @transform_1, window_bounds = array<i64: 16, 128>}, {transform_indices = @transform_2, window_bounds = array<i64: 8, 128>}, {transform_indices = @transform_3, window_bounds = array<i64: 8, 128>}]} {
    %cst = arith.constant 0.000000e+00 : f32
    %0 = vector.broadcast %cst : f32 to vector<8x128xf32>
    %cst_0 = arith.constant 0.000000e+00 : f32
    %1 = vector.broadcast %cst_0 : f32 to vector<8x128xf32>
    %c0_i32 = arith.constant 0 : i32
    %c16_i32 = arith.constant 16 : i32
    %2 = arith.muli %c0_i32, %c16_i32 : i32
    %3 = tpu.assume_multiple %2, 8 : i32
    %4 = arith.index_cast %3 : i32 to index
    %c0 = arith.constant 0 : index
    %5 = vector.load %arg2[%4, %c0] : memref<16x128xf32, #tpu.memory_space<vmem>>, vector<16x128xf32>
    %6 = arith.index_cast %3 : i32 to index
    %c0_1 = arith.constant 0 : index
    %7 = vector.load %arg1[%6, %c0_1] : memref<16x128xf32, #tpu.memory_space<vmem>>, vector<16x128xf32>
    %cst_2 = arith.constant 0.000000e+00 : f32
    %8 = vector.broadcast %cst_2 : f32 to vector<16x128xf32>
    %9 = arith.cmpf ogt, %5, %8 : vector<16x128xf32>
    %10 = arith.subf %5, %7 : vector<16x128xf32>
    %cst_3 = arith.constant 0.000000e+00 : f32
    %11 = vector.broadcast %cst_3 : f32 to vector<16x128xf32>
    %12 = arith.select %9, %10, %11 : vector<16x128xi1>, vector<16x128xf32>
    %13 = arith.extui %9 : vector<16x128xi1> to vector<16x128xi32>
    %14 = arith.sitofp %13 : vector<16x128xi32> to vector<16x128xf32>
    %15 = arith.mulf %12, %12 : vector<16x128xf32>
    %16 = vector.shape_cast %15 : vector<16x128xf32> to vector<2x8x128xf32>
    %cst_4 = arith.constant dense<0.000000e+00> : vector<8x128xf32>
    %17 = vector.multi_reduction <add>, %16, %cst_4 [0] : vector<2x8x128xf32> to vector<8x128xf32>
    %18 = vector.shape_cast %14 : vector<16x128xf32> to vector<2x8x128xf32>
    %cst_5 = arith.constant dense<0.000000e+00> : vector<8x128xf32>
    %19 = vector.multi_reduction <add>, %18, %cst_5 [0] : vector<2x8x128xf32> to vector<8x128xf32>
    %20 = arith.addf %0, %17 : vector<8x128xf32>
    %21 = arith.addf %1, %19 : vector<8x128xf32>
    %c1_i32 = arith.constant 1 : i32
    %c0_6 = arith.constant 0 : index
    %c0_7 = arith.constant 0 : index
    %22 = vector.load %arg3[%c0_6, %c0_7] : memref<8x128xf32, #tpu.memory_space<vmem>>, vector<8x128xf32>
    tpu.vector_store %arg3[%c0_6, %c0_7], %20 {strides = array<i32>} : memref<8x128xf32, #tpu.memory_space<vmem>>, vector<8x128xf32>,
    %c0_8 = arith.constant 0 : index
    %c0_9 = arith.constant 0 : index
    %23 = vector.load %arg4[%c0_8, %c0_9] : memref<8x128xf32, #tpu.memory_space<vmem>>, vector<8x128xf32>
    tpu.vector_store %arg4[%c0_8, %c0_9], %21 {strides = array<i32>} : memref<8x128xf32, #tpu.memory_space<vmem>>, vector<8x128xf32>,
    return
  }
  func.func @transform_0(%arg0: i32) -> (i32, i32) {
    %c0_i32 = arith.constant 0 : i32
    %c0_i32_0 = arith.constant 0 : i32
    return %arg0, %c0_i32 : i32, i32
  }
  func.func @transform_1(%arg0: i32) -> (i32, i32) {
    %c0_i32 = arith.constant 0 : i32
    %c0_i32_0 = arith.constant 0 : i32
    return %arg0, %c0_i32 : i32, i32
  }
  func.func @transform_2(%arg0: i32) -> (i32, i32) {
    %c0_i32 = arith.constant 0 : i32
    %c0_i32_0 = arith.constant 0 : i32
    return %arg0, %c0_i32 : i32, i32
  }
  func.func @transform_3(%arg0: i32) -> (i32, i32) {
    %c0_i32 = arith.constant 0 : i32
    %c0_i32_0 = arith.constant 0 : i32
    return %arg0, %c0_i32 : i32, i32
  }
}

</mosaic_0001>

<bundles_post_ra>
// kernel: tpu_custom_call.1
= control target key start
LH: loop header
LB: loop body
LE: loop exit
PB: predicated region body
PF: predicated region fallthrough
CT: control target
= control target key end

     0   :  { %9 = vsyncpa [#allocation3], 0  ;;  %s255_s0 = inlined_call_operand.hbm [shape: f32[16,128], index: 0, kind: input, shape index: {}]   ;;  %s256_s1 = inlined_call_operand.hbm [shape: f32[16,128], index: 1, kind: input, shape index: {}]   ;;  %s257_s2 = inlined_call_operand.hbm [shape: f32[8,128], index: 2, kind: output, shape index: {0}]   ;;  %s258_s3 = inlined_call_operand.hbm [shape: f32[8,128], index: 3, kind: output, shape index: {1}]  }
   0x1   :  { %10 = vsyncpa [#allocation6], 0 }
   0x2   :  { %11 = vsyncpa [#allocation4], 0 }
   0x3   :  { %12 = vsyncpa [#allocation9], 0  ;;  %s17_s14 = sshll.u32 %s255_s0, 4  ;;  %s216_s15 = smov [#allocation2]   ;;  %s18_s14 = int_to_ptr.hbm [resolvable:$true] %s17_s14 }
   0x4   :  { %s19_s16 = sshll.u32 %s216_s15, 4  ;;  %s30_s19 = sshll.u32 %s256_s1, 4  ;;  %s20_s16 = int_to_ptr.vmem [resolvable:$true] %s19_s16  ;;  %s31_s19 = int_to_ptr.hbm [resolvable:$true] %s30_s19 }
   0x5   :  { %s217_s20 = smov 128   ;;  %s218_s21 = smov 8  }
   0x6   :  { %25 = dma.hbm_to_vmem [thread:$0]  %s18_s14, 256, %s20_s16, [#allocation3], %s217_s20, %s217_s20, %s218_s21  }
   0x7   :  { %s219_s22 = smov [#allocation5]  }
   0x8   :  { %s32_s23 = sshll.u32 %s219_s22, 4  ;;  %s33_s23 = int_to_ptr.vmem [resolvable:$true] %s32_s23 }
   0x9   :  { %38 = dma.hbm_to_vmem [thread:$0]  %s31_s19, 256, %s33_s23, [#allocation6], %s217_s20, %s217_s20, %s218_s21  }
   0xa   :  { %208 = dma.done.wait [#allocation3], 256  }
   0xb   :  { %209 = vsyncadd [#allocation3], 4294967040 }
   0xc   :  { %210 = dma.done.wait [#allocation6], 256  }
   0xd   :  { %211 = vsyncadd [#allocation6], 4294967040  ;;  %v47_v0 = vld [vmem:[#allocation5] sm:$0xff]  ;;  %v48_v1 = vld [vmem:[#allocation5 + $0x8] sm:$0xff]  ;;  %s220_s0 = smov [#allocation8]   ;;  %s87_s1 = sshll.u32 %s258_s3, 4  ;;  %s88_s1 = int_to_ptr.hbm [resolvable:$true] %s87_s1 }
   0xe   :  { %v49_v2 = vld [vmem:[#allocation2] sm:$0xff]  ;;  %s85_s24 = sshll.u32 %s220_s0, 4  ;;  %v50_v3 = vld [vmem:[#allocation2 + $0x8] sm:$0xff]  ;;  %vm51_vm0 = vcmp.gt.f32.partialorder %v47_v0, 0.0  ;;  %vm52_vm1 = vcmp.gt.f32.partialorder %v48_v1, 0.0  ;;  %v221_v6 = vmov 0.0   ;;  %s86_s24 = int_to_ptr.vmem [resolvable:$true] %s85_s24 }
   0xf   :  { %v53_v4 = vsub.f32 %v47_v0, %v49_v2  ;;  %v54_v5 = vsub.f32 %v48_v1, %v50_v3  ;;  %v103_v7 = vsel %vm51_vm0, 1.0, %v221_v6  ;;  %v104_v8 = vsel %vm52_vm1, 1.0, %v221_v6  ;;  %s222_s27 = smov [#allocation7]   ;;  %s76_s3 = sshll.u32 %s257_s2, 4  ;;  %s77_s3 = int_to_ptr.hbm [resolvable:$true] %s76_s3 }
  0x10   :  { %v64_v10 = vadd.f32 %v104_v8, %v103_v7  ;;  %s74_s28 = sshll.u32 %s222_s27, 4  ;;  %s75_s28 = int_to_ptr.vmem [resolvable:$true] %s74_s28 }
  0x11   :  { %v55_v9 = vsel %vm51_vm0, %v53_v4, 0.0  ;;  %v56_v11 = vsel %vm52_vm1, %v54_v5, 0.0 }
  0x12   :  { %v61_v12 = vmul.f32 %v55_v9, %v55_v9  ;;  %v62_v13 = vmul.f32 %v56_v11, %v56_v11  ;;  %68 = vst [vmem:[#allocation8] sm:$0xff] %v64_v10 }
  0x13   :  { %90 = dma.vmem_to_hbm [thread:$0]  %s86_s24, 128, %s88_s1, [#allocation9]  }
  0x14   :  { %v63_v14 = vadd.f32 %v62_v13, %v61_v12 }
  0x16   :  { %67 = vst [vmem:[#allocation7] sm:$0xff] %v63_v14 }
  0x17   :  { %79 = dma.vmem_to_hbm [thread:$0]  %s75_s28, 128, %s77_s3, [#allocation4]  }
  0x18   :  { %212 = dma.done.wait [#allocation4], 128  }
  0x19   :  { %213 = vsyncadd [#allocation4], 4294967168 }
  0x1a   :  { %214 = dma.done.wait [#allocation9], 128  }
  0x1b   :  { %215 = vsyncadd [#allocation9], 4294967168 }
  0x1c   :  { %99 = vsyncpa [#allocation3], 1 }
  0x1d   :  { %100 = vsyncpa [#allocation6], 1 }
  0x1e   :  { %101 = vsyncpa [#allocation4], 1 }
  0x1f   :  { %102 = vsyncpa [#allocation9], 1 }

</bundles_post_ra>
